<compile_context>
chip_gen: v6e
topology: v6e:2x2x1
jax: 0.10.0
libtpu: 0.0.40
codegen_flags: <defaults>
</compile_context>

<pallas_src>
import numpy as np
import jax
import jax.numpy as jnp
from jax.experimental import pallas as pl
from jax.experimental.pallas import tpu as pltpu


# ----------------------------- Hparams --------------------------------------
class Hparams:
    enc_output_size = 128       # encoder hidden size feeding key/value proj
    dec_output_size = 128       # decoder hidden size feeding query proj
    att_projection_size = 128   # attention projection dim (lane-dense)


# --------------------- block_diagonal weight init (as in spec) --------------
def block_diagonal(shape, K):
    out = np.zeros(shape, np.float32)
    val = 1.0 / (2 * K + 1)
    for i in range(shape[1]):
        a = max(0, i - K)
        b = min(shape[1] - 1, i + K)
        out[a:b, i] = val
    return out


# ------------------- Kernel 1: fused key/value projection -------------------
# grid=(B,) marked "parallel": on v7x both TensorCores work, elsewhere it is a
# cheap 2-step loop.  One MXU matmul per batch row produces key AND value
# together (bias folded into the (E, 2P) operand layout).
def _kv_proj_kernel(enc_ref, wkv_ref, bkv_ref, k_ref, v_ref):
    _, T, E = enc_ref.shape
    P = k_ref.shape[2]
    x = enc_ref[...].reshape(T, E)                                   # bf16
    kv = jnp.dot(x, wkv_ref[...],
                 preferred_element_type=jnp.float32) + bkv_ref[...]  # (T, 2P) f32
    k_ref[...] = kv[:, :P].reshape(1, T, P)    # lane-aligned split at P=128
    v_ref[...] = kv[:, P:].reshape(1, T, P)


def kv_projection(encoder_outputs_bf16, wkv_t, bkv):
    B, T, E = encoder_outputs_bf16.shape
    P2 = wkv_t.shape[1]
    P = P2 // 2
    grid_spec = pltpu.PrefetchScalarGridSpec(
        num_scalar_prefetch=0,
        grid=(B,),
        in_specs=[pl.BlockSpec((1, T, E), lambda b: (b, 0, 0)),
                  pl.BlockSpec((E, P2), lambda b: (0, 0)),
                  pl.BlockSpec((1, P2), lambda b: (0, 0))],
        out_specs=[pl.BlockSpec((1, T, P), lambda b: (b, 0, 0)),
                   pl.BlockSpec((1, T, P), lambda b: (b, 0, 0))],
    )
    return pl.pallas_call(
        _kv_proj_kernel,
        out_shape=(jax.ShapeDtypeStruct((B, T, P), jnp.float32),
                   jax.ShapeDtypeStruct((B, T, P), jnp.float32)),
        grid_spec=grid_spec,
        compiler_params=pltpu.CompilerParams(
            dimension_semantics=("parallel",)),
    )(encoder_outputs_bf16, wkv_t, bkv)


# --------- Kernel 2: query proj + masked softmax attention (S steps) --------
# Gridless: everything (wq, bq, K, V, S queries) fits in VMEM at these sizes,
# and a single dispatch handles all S decoder steps.
def _attention_kernel(lens_ref, dec_ref, wq_ref, bq_ref, k_ref, v_ref,
                      ctx_ref, attn_ref):
    B, S, D = dec_ref.shape
    T = k_ref.shape[1]
    P = k_ref.shape[2]

    # Query projection: ONE MXU matmul over all S steps (bf16 x bf16 -> f32).
    # The 1/sqrt(P) scale is already folded into wq/bq at init time.
    q = (jnp.dot(dec_ref[...].reshape(B * S, D), wq_ref[...],
                 preferred_element_type=jnp.float32) + bq_ref[...])
    q = q.reshape(B, S, P)

    # Raw scores on the MXU: (B,S,P) x (B,T,P) -> (B,S,T), f32 accumulation.
    raw = jnp.einsum('bsp,btp->bst', q, k_ref[...],
                     preferred_element_type=jnp.float32)

    # Length mask rebuilt in-kernel from the (B,1) int32 lengths.  A large
    # finite negative (not -inf) keeps zero-length rows NaN-free.
    t_idx = jax.lax.broadcasted_iota(jnp.int32, (B, S, T), 2)
    pad = t_idx >= lens_ref[...].reshape(B, 1, 1)                   # (B,S,T)
    masked = jnp.where(pad, jnp.float32(-1e30), raw)

    # Numerically-stable softmax over T (f32 elementwise; reciprocal on EUP).
    m = jnp.max(masked, axis=-1, keepdims=True)
    e = jnp.where(pad, jnp.float32(0.0), jnp.exp(masked - m))       # padded -> 0
    s = jnp.sum(e, axis=-1, keepdims=True)
    attn = e * pl.reciprocal(jnp.maximum(s, jnp.float32(1e-30)), approx=True)

    # Context on the MXU: (B,S,T) x (B,T,P) -> (B,S,P).
    ctx_ref[...] = jnp.einsum('bst,btp->bsp', attn, v_ref[...],
                              preferred_element_type=jnp.float32)
    attn_ref[...] = attn


def attention_steps(lens_b1, dec_steps_bf16, wq_t, bq, key, value):
    B, S, D = dec_steps_bf16.shape
    _, T, P = key.shape
    return pl.pallas_call(
        _attention_kernel,
        out_shape=(jax.ShapeDtypeStruct((B, S, P), jnp.float32),
                   jax.ShapeDtypeStruct((B, S, T), jnp.float32)),
    )(lens_b1, dec_steps_bf16, wq_t, bq, key, value)


# ----------------------------- module wrapper --------------------------------
class AttentionPallas:
    def __init__(self, hparams, rng_key):
        E = hparams.enc_output_size
        D = hparams.dec_output_size
        P = hparams.att_projection_size
        self.hparams = hparams

        # nn.Linear weights (out_features, in_features) re-init'd block_diagonal
        wk = block_diagonal((P, E), K=5)
        wv = block_diagonal((P, E), K=5)
        wq = block_diagonal((P, D), K=5)
        kk, kvb, kq = jax.random.split(rng_key, 3)
        # default nn.Linear bias init: U(-1/sqrt(in_features), 1/sqrt(in_features))
        bk = jax.random.uniform(kk, (P,), jnp.float32,
                                -1.0 / np.sqrt(E), 1.0 / np.sqrt(E))
        bv = jax.random.uniform(kvb, (P,), jnp.float32,
                                -1.0 / np.sqrt(E), 1.0 / np.sqrt(E))
        bq = jax.random.uniform(kq, (P,), jnp.float32,
                                -1.0 / np.sqrt(D), 1.0 / np.sqrt(D))

        # Fuse key & value projections into one (E, 2P) bf16 MXU operand.
        self.wkv_t = jnp.asarray(np.concatenate([wk.T, wv.T], axis=1)
                                 ).astype(jnp.bfloat16)              # (E, 2P)
        self.bkv = jnp.concatenate([bk, bv]).reshape(1, 2 * P)       # f32

        # Fold the 1/sqrt(att_projection_size) score scale into wq/bq.
        scale = np.float32(1.0 / np.sqrt(P))
        self.wq_t = jnp.asarray(wq.T * scale).astype(jnp.bfloat16)   # (D, P)
        self.bq = (bq * scale).reshape(1, P)                         # f32

        self.key = None
        self.value = None
        self.lens_b1 = None

    def set_key_value_mask(self, encoder_outputs, encoder_lens):
        # bf16 activations halve the projection's operand DMA; f32 accumulate.
        self.key, self.value = kv_projection(
            encoder_outputs.astype(jnp.bfloat16), self.wkv_t, self.bkv)
        # padding mask is rebuilt inside the attention kernel from lengths.
        self.lens_b1 = jnp.asarray(encoder_lens, jnp.int32).reshape(-1, 1)

    def forward_steps(self, decoder_output_embeddings):
        """Batched decode: (B, S, D) -> context (B, S, P), weights (B, S, T).
        One pallas_call for all S steps: wq/bq/key/value are loaded once."""
        dec_bf16 = decoder_output_embeddings.astype(jnp.bfloat16)
        return attention_steps(self.lens_b1, dec_bf16, self.wq_t, self.bq,
                               self.key, self.value)

    def forward(self, decoder_output_embedding):
        """Module-equivalent single step: (B, D) -> (B, P), (B, T)."""
        ctx, attn = self.forward_steps(decoder_output_embedding[:, None, :])
        return ctx[:, 0, :], attn[:, 0, :]


# ----------------------------- main ------------------------------------------
if __name__ == "__main__":
    hp = Hparams()
    root = jax.random.PRNGKey(0)
    k_param, k_enc, k_dec, k_steps = jax.random.split(root, 4)

    B, T, S = 2, 16, 4
    E, D, P = hp.enc_output_size, hp.dec_output_size, hp.att_projection_size

    attn_mod = AttentionPallas(hp, k_param)

    encoder_outputs = jax.random.normal(k_enc, (B, T, E), jnp.float32)
    encoder_lens = jnp.array([16, 11], jnp.int32)
    decoder_emb = jax.random.normal(k_dec, (B, D), jnp.float32)

    attn_mod.set_key_value_mask(encoder_outputs, encoder_lens)

    # --- single decoder step (exactly the module's forward) ---
    context, attention_weights = attn_mod.forward(decoder_emb)
    context = jax.block_until_ready(context)
    attention_weights = jax.block_until_ready(attention_weights)

    assert context.shape == (B, P)
    assert attention_weights.shape == (B, T)
    assert bool(jnp.all(jnp.isfinite(context)))
    assert bool(jnp.all(jnp.isfinite(attention_weights)))
    row_sums = jnp.sum(attention_weights, axis=1)
    assert bool(jnp.all(jnp.abs(row_sums - 1.0) < 1e-2))
    assert bool(jnp.all(attention_weights[1, 11:] == 0.0))

    # --- batched decode steps: one dispatch for S steps (amortizes overhead) ---
    dec_steps = jax.random.normal(k_steps, (B, S, D), jnp.float32)
    dec_steps = dec_steps.at[:, 0, :].set(decoder_emb)
    ctx_s, attn_s = attn_mod.forward_steps(dec_steps)
    ctx_s = jax.block_until_ready(ctx_s)
    attn_s = jax.block_until_ready(attn_s)

    assert ctx_s.shape == (B, S, P)
    assert attn_s.shape == (B, S, T)
    assert bool(jnp.all(jnp.isfinite(ctx_s)))
    assert bool(jnp.all(jnp.isfinite(attn_s)))
    row_sums_s = jnp.sum(attn_s, axis=-1)
    assert bool(jnp.all(jnp.abs(row_sums_s - 1.0) < 1e-2))
    # step 0 of the batched call matches the single-step forward
    assert bool(jnp.allclose(ctx_s[:, 0, :], context, atol=1e-3, rtol=1e-3))
    assert bool(jnp.allclose(attn_s[:, 0, :], attention_weights, atol=1e-3))

    print("KERNEL_OK")
</pallas_src>

<mosaic_0001>
module attributes {stable_mosaic.version = 11 : i64} {
  func.func @_kv_proj_kernel(%arg0: i32, %arg1: memref<1x16x128xbf16, #tpu.memory_space<vmem>>, %arg2: memref<128x256xbf16, #tpu.memory_space<vmem>>, %arg3: memref<1x256xf32, #tpu.memory_space<vmem>>, %arg4: memref<1x16x128xf32, #tpu.memory_space<vmem>>, %arg5: memref<1x16x128xf32, #tpu.memory_space<vmem>>) attributes {dimension_semantics = [#tpu.dimension_semantics<parallel>], iteration_bounds = array<i64: 2>, scalar_prefetch = 0 : i64, scratch_operands = 0 : i64, tpu.core_type = #tpu.core_type<tc>, window_params = [{transform_indices = @transform_0, window_bounds = array<i64: 1, 16, 128>}, {pipeline_mode = #tpu.pipeline_mode<synchronous>, transform_indices = @transform_1, window_bounds = array<i64: 128, 256>}, {pipeline_mode = #tpu.pipeline_mode<synchronous>, transform_indices = @transform_2, window_bounds = array<i64: 1, 256>}, {transform_indices = @transform_3, window_bounds = array<i64: 1, 16, 128>}, {transform_indices = @transform_4, window_bounds = array<i64: 1, 16, 128>}]} {
    %c0 = arith.constant 0 : index
    %c0_0 = arith.constant 0 : index
    %c0_1 = arith.constant 0 : index
    %0 = vector.load %arg1[%c0, %c0_0, %c0_1] : memref<1x16x128xbf16, #tpu.memory_space<vmem>>, vector<1x16x128xbf16>
    %1 = vector.shape_cast %0 : vector<1x16x128xbf16> to vector<16x128xbf16>
    %c0_2 = arith.constant 0 : index
    %c0_3 = arith.constant 0 : index
    %2 = vector.load %arg2[%c0_2, %c0_3] : memref<128x256xbf16, #tpu.memory_space<vmem>>, vector<128x256xbf16>
    %cst = arith.constant dense<0.000000e+00> : vector<16x256xf32>
    %3 = tpu.matmul %1, %2, %cst {dimension_numbers = #tpu.dot_dimension_numbers<[1], [0], [0], [1], [0, 0, 1, 1], [], []>} : vector<16x128xbf16>, vector<128x256xbf16>, vector<16x256xf32> -> vector<16x256xf32>
    %c0_4 = arith.constant 0 : index
    %c0_5 = arith.constant 0 : index
    %4 = vector.load %arg3[%c0_4, %c0_5] : memref<1x256xf32, #tpu.memory_space<vmem>>, vector<1x256xf32>
    %5 = vector.broadcast %4 : vector<1x256xf32> to vector<16x256xf32>
    %6 = arith.addf %3, %5 : vector<16x256xf32>
    %7 = vector.extract_strided_slice %6 {offsets = [0, 0], sizes = [16, 128], strides = [1, 1]} : vector<16x256xf32> to vector<16x128xf32>
    %8 = vector.shape_cast %7 : vector<16x128xf32> to vector<1x16x128xf32>
    %c0_6 = arith.constant 0 : index
    %c0_7 = arith.constant 0 : index
    %c0_8 = arith.constant 0 : index
    %9 = vector.load %arg4[%c0_6, %c0_7, %c0_8] : memref<1x16x128xf32, #tpu.memory_space<vmem>>, vector<1x16x128xf32>
    tpu.vector_store %arg4[%c0_6, %c0_7, %c0_8], %8 {strides = array<i32>} : memref<1x16x128xf32, #tpu.memory_space<vmem>>, vector<1x16x128xf32>,
    %10 = vector.extract_strided_slice %6 {offsets = [0, 128], sizes = [16, 128], strides = [1, 1]} : vector<16x256xf32> to vector<16x128xf32>
    %11 = vector.shape_cast %10 : vector<16x128xf32> to vector<1x16x128xf32>
    %c0_9 = arith.constant 0 : index
    %c0_10 = arith.constant 0 : index
    %c0_11 = arith.constant 0 : index
    %12 = vector.load %arg5[%c0_9, %c0_10, %c0_11] : memref<1x16x128xf32, #tpu.memory_space<vmem>>, vector<1x16x128xf32>
    tpu.vector_store %arg5[%c0_9, %c0_10, %c0_11], %11 {strides = array<i32>} : memref<1x16x128xf32, #tpu.memory_space<vmem>>, vector<1x16x128xf32>,
    return
  }
  func.func @transform_0(%arg0: i32) -> (i32, i32, i32) {
    %c0_i32 = arith.constant 0 : i32
    %c0_i32_0 = arith.constant 0 : i32
    %c0_i32_1 = arith.constant 0 : i32
    return %arg0, %c0_i32, %c0_i32_0 : i32, i32, i32
  }
  func.func @transform_1(%arg0: i32) -> (i32, i32) {
    %c0_i32 = arith.constant 0 : i32
    %c0_i32_0 = arith.constant 0 : i32
    %c0_i32_1 = arith.constant 0 : i32
    return %c0_i32, %c0_i32_0 : i32, i32
  }
  func.func @transform_2(%arg0: i32) -> (i32, i32) {
    %c0_i32 = arith.constant 0 : i32
    %c0_i32_0 = arith.constant 0 : i32
    %c0_i32_1 = arith.constant 0 : i32
    return %c0_i32, %c0_i32_0 : i32, i32
  }
  func.func @transform_3(%arg0: i32) -> (i32, i32, i32) {
    %c0_i32 = arith.constant 0 : i32
    %c0_i32_0 = arith.constant 0 : i32
    %c0_i32_1 = arith.constant 0 : i32
    return %arg0, %c0_i32, %c0_i32_0 : i32, i32, i32
  }
  func.func @transform_4(%arg0: i32) -> (i32, i32, i32) {
    %c0_i32 = arith.constant 0 : i32
    %c0_i32_0 = arith.constant 0 : i32
    %c0_i32_1 = arith.constant 0 : i32
    return %arg0, %c0_i32, %c0_i32_0 : i32, i32, i32
  }
}

</mosaic_0001>

<bundles_post_ra>
// kernel: tpu_custom_call.1
= control target key start
LH: loop header
LB: loop body
LE: loop exit
PB: predicated region body
PF: predicated region fallthrough
CT: control target
= control target key end

     0   :  { %10 = vsyncpa [#allocation3], 0  ;;  %s1103_s0 = inlined_call_operand.hbm [shape: bf16[2,16,128], index: 0, kind: input, shape index: {}]   ;;  %s1104_s1 = inlined_call_operand.hbm [shape: bf16[128,256], index: 1, kind: input, shape index: {}]   ;;  %s1105_s2 = inlined_call_operand.vmem [shape: f32[1,256], index: 2, kind: input, shape index: {}]   ;;  %s1106_s3 = inlined_call_operand.hbm [shape: f32[2,16,128], index: 3, kind: output, shape index: {0}]   ;;  %s1107_s4 = inlined_call_operand.hbm [shape: f32[2,16,128], index: 4, kind: output, shape index: {1}]  }
   0x1   :  { %12 = vsyncpa [#allocation3 + $0x1], 0 }
   0x2   :  { %13 = vsyncpa [#allocation6], 0 }
   0x3   :  { %14 = vsyncpa [#allocation4], 0 }
   0x4   :  { %16 = vsyncpa [#allocation4 + $0x1], 0 }
   0x5   :  { %17 = vsyncpa [#allocation9], 0 }
   0x6   :  { %19 = vsyncpa [#allocation9 + $0x1], 0  ;;  %s880_s15 = smov 0   ;;  %s882_s16 = smov 0  }
   0x7   :  { %s884_s17 = smov 0   ;;  %s886_s18 = smov 0  }
   0x8 LB: > { %s901_s19 = sadd.s32 4294967295, %s842_s18   ;;  %s556_s20 = sadd.s32 4294967294, %s842_s18   ;;  %s842_s18 = sphi %s886_s18, %s1129_s18   ;;  %s838_s17 = sphi %s884_s17, %s1128_s17   ;;  %s834_s16 = sphi %s882_s16, %s1127_s16   ;;  %s830_s15 = sphi %s880_s15, %s1126_s15  }
   0x9   : > { %p45_p0 = scmp.ne.s32.totalorder %s834_s16, %s830_s15  ;;  %p1108_p1 = scmp.eq.s32.totalorder %s901_s19, 0 }
   0xa   : > { %p117_p3 = scmp.eq.s32.totalorder %s556_s20, 1  ;;  %p557_p5 = scmp.ge.s32.totalorder %s842_s18, 1 }
   0xb   : > { %p910_p4 = por %p1108_p1, %p45_p0  ;;  %p150_p7 = scmp.lt.s32.totalorder %s842_s18, 3 }
   0xc   : > { %p915_p6 = por %p117_p3, %p45_p0  ;;  %s844_s24 = smov [#allocation5]  }
   0xd   : > { %s1112_s21 = scalar_select %p910_p4, 1, 0 }
   0xe   : > { %s1113_s22 = scalar_select %p915_p6, 1, 0 }
   0xf   : > { %p920_p8 = pnand %p557_p5, %p150_p7  ;;  %s162_s25 = sshll.u32 %s844_s24, 4  ;;  %s163_s25 = int_to_ptr.vmem [resolvable:$true] %s162_s25 }
  0x10   : > { %s934_s27 = sadd.s32 1, %s842_s18   ;;  %s32_s28 = sadd.s32 1, %s838_s17 }
  0x11   : > { %s1114_s23 = scalar_select %p920_p8, 1, 0 }
  0x12   : > { %p606_p9 = pneg %p920_p8  ;;  %s29_s29 = ssub.s32 %s842_s18, %s934_s27 }
  0x13   : > { %s701_s30 = scalar_lea.vmem %s163_s25, 2048  ;;  %p709_p5 = scmp.lt.s32.totalorder %s163_s25, %s163_s25 }
  0x14   : > { %p929_p11 = pnand %p606_p9, %p1108_p1  ;;  %p702_p13 = scmp.ne.s32.totalorder %s163_s25, %s701_s30 }
  0x15   : > { %p710_p7 = scmp.lt.s32.totalorder %s701_s30, %s701_s30 }
  0x16   : > { %p692_p12 = pneg %p929_p11 }
  0x17   : > { %p711_p10 = por %p710_p7, %p709_p5 }
  0x18   : > { %p704_p0 = pnand %p702_p13, %p692_p12 }
  0x1a   : > { %p705_p3 = pneg %p704_p0 }
  0x1c   : > { %p712_p2 = pnand %p711_p10, %p705_p3 }
  0x1e   : > { %715 = shalt.err (!%p712_p2)
}
  0x1f   : > { %s845_s5 = smov 128   ;;  %s846_s6 = smov 8  }
  0x20   : > { %609 = dma.hbm_to_vmem [thread:$0]  (!%p929_p11), %s1104_s1, 2048, %s163_s25, [#allocation6], %s845_s5, %s845_s5, %s846_s6  }
  0x21   : > { %p30_p9 = scmp.eq.s32.totalorder %s29_s29, 0  ;;  %p39_p12 = scmp.ne.s32.totalorder %s838_s17, %s834_s16 }
  0x22   : > { %p40_p10 = scmp.eq.s32.totalorder %s842_s18, 0  ;;  %p622_p2 = scmp.lt.s32.totalorder %s842_s18, 2 }
  0x23   : > { %s951_s9 = scalar_select %p30_p9, %s838_s17, %s32_s28  }
  0x24   : > { %p41_p13 = por %p40_p10, %p39_p12  ;;  %p1116_p0 = scmp.eq.s32.totalorder %s901_s19, 1 }
  0x25   : > { %s179_s11 = sand.u32 1, %s838_s17   ;;  %s593_s12 = sshll.u32 %s842_s18, 7 }
  0x26   : > { %p955_p3 = por %p1116_p0, %p39_p12  ;;  %s560_s13 = sshll.u32 %s179_s11, 3 }
  0x27   : > { %s964_s24 = scalar_lea.hbm %s1103_s0, %s593_s12  ;;  %s183_s25 = scalar_lea.vmem [#allocation2], %s560_s13 }
  0x28   : > { %s1117_s10 = scalar_select %p955_p3, 1, 0 }
  0x29   : > { %s190_s26 = sshll.u32 %s183_s25, 4  ;;  %p966_p11 = pnand %p622_p2, %p41_p13  ;;  %s970_s26 = int_to_ptr.vmem [resolvable:$true] %s190_s26 }
  0x2a   : > { %s972_s29 = scalar_lea.sflag [#allocation3], %s179_s11  ;;  %s716_s30 = scalar_lea.hbm %s964_s24, 128 }
  0x2b   : > { %p717_p5 = scmp.ne.s32.totalorder %s964_s24, %s716_s30  ;;  %p718_p7 = pneg %p966_p11 }
  0x2c   : > { %s721_s7 = scalar_lea.hbm %s1103_s0, 256  ;;  %p722_p10 = scmp.lt.s32.totalorder %s964_s24, %s1103_s0 }
  0x2d   : > { %p719_p9 = pnand %p718_p7, %p717_p5  ;;  %p723_p2 = scmp.lt.s32.totalorder %s721_s7, %s716_s30 }
  0x2f   : > { %p720_p12 = pneg %p719_p9  ;;  %p724_p13 = por %p723_p2, %p722_p10 }
  0x31   : > { %p725_p0 = pnand %p724_p13, %p720_p12 }
  0x33   : > { %728 = shalt.err (!%p725_p0)
}
  0x34   : > { %s729_s11 = scalar_lea.vmem %s970_s26, 128  ;;  %s847_s13 = smov [#allocation2]  }
  0x35   : > { %p730_p1 = scmp.ne.s32.totalorder %s970_s26, %s729_s11  ;;  %s734_s14 = sshll.u32 %s847_s13, 4  ;;  %s735_s14 = int_to_ptr.vmem [resolvable:$false] %s734_s14 }
  0x36   : > { %s736_s20 = scalar_lea.vmem %s735_s14, 256  ;;  %p737_p9 = scmp.lt.s32.totalorder %s970_s26, %s735_s14 }
  0x37   : > { %p732_p6 = pnand %p730_p1, %p718_p7  ;;  %p738_p3 = scmp.lt.s32.totalorder %s736_s20, %s729_s11 }
  0x39   : > { %p733_p5 = pneg %p732_p6  ;;  %p739_p4 = por %p738_p3, %p737_p9 }
  0x3b   : > { %p740_p8 = pnand %p739_p4, %p733_p5 }
  0x3d   : > { %743 = shalt.err (!%p740_p8)
}
  0x3e   : > { %s848_s25 = smov 64   ;;  %s849_s30 = smov 4  }
  0x3f   : > { %613 = dma.hbm_to_vmem [thread:$0]  (!%p966_p11), %s964_s24, 128, %s970_s26, %s972_s29, %s848_s25, %s848_s25, %s849_s30  }
  0x40   : > { %p1119_p1 = scmp.ne.s32.totalorder %s1114_s23, 0 }
  0x41   : > { %s996_s5 = sand.u32 (!%p1119_p1), 1, %s834_s16   ;;  %p1120_p4 = scmp.ne.s32.totalorder (!%p1119_p1), %s1112_s21, 0 }
  0x42   : > { %202 = sbr.rel (%p1119_p1) target bundleno = 343 (0x157), region = 32  ;;  %s564_s6 = sshll.u32 (!%p1119_p1), %s996_s5, 3 }
  0x43   : > { %s205_s7 = scalar_lea.sflag (!%p1119_p1), [#allocation3], %s996_s5  ;;  %s1000_s8 = scalar_lea.vmem (!%p1119_p1), [#allocation2], %s564_s6 }
  0x47   : > { %813 = dma.done.wait (%p1120_p4), %s205_s7, 128  }
  0x48   : > { %815 = vsyncadd (%p1120_p4), %s205_s7, 4294967168  ;;  %p1121_p6 = scmp.eq.s32.totalorder %s901_s19, 0 }
  0x4a   : > { %817 = dma.done.wait (%p1121_p6), [#allocation6], 2048   ;;  %p1122_p8 = pmov %p1121_p6 }
  0x4b   : > { %v850_v0 = vmov 0   ;;  %v665_v1 = vld [vmem:[#allocation5 + $0x74] ss:$8 sps:$4 sm:$0xff]   ;;  %v667_v2 = vld [vmem:[#allocation5 + $0x70] ss:$8 sps:$4 sm:$0xff]   ;;  %v263_v18 = vlaneseq  ;;  %s566_s24 = sshll.u32 %s996_s5, 4 }
  0x4c   : > { %819 = vsyncadd (%p1122_p8), [#allocation6], 4294965248  ;;  %391 = vmatprep.mubr.bf16.mxu0 %v850_v0  ;;  %359 = vmatprep.subr.bf16.mxu0 %v665_v1  ;;  %v668_v3 = vld [vmem:[#allocation5 + $0x64] ss:$8 sps:$4 sm:$0xff]   ;;  %v670_v4 = vld [vmem:[#allocation5 + $0x60] ss:$8 sps:$4 sm:$0xff]  }
  0x4d   : > { %360 = vmatpush1.bf16.msra.mxu0 %v667_v2  ;;  %v671_v5 = vld [vmem:[#allocation5 + $0x54] ss:$8 sps:$4 sm:$0xff]   ;;  %v673_v6 = vld [vmem:[#allocation5 + $0x50] ss:$8 sps:$4 sm:$0xff]   ;;  %v674_v7 = vld [vmem:[#allocation5 + $0x44] ss:$8 sps:$4 sm:$0xff]  }
  0x4e   : > { %361 = vmatprep.subr.bf16.mxu0 %v668_v3  ;;  %v676_v8 = vld [vmem:[#allocation5 + $0x40] ss:$8 sps:$4 sm:$0xff]   ;;  %v677_v9 = vld [vmem:[#allocation5 + $0x34] ss:$8 sps:$4 sm:$0xff]   ;;  %v679_v10 = vld [vmem:[#allocation5 + $0x30] ss:$8 sps:$4 sm:$0xff]  }
  0x4f   : > { %v680_v11 = vld [vmem:[#allocation5 + $0x24] ss:$8 sps:$4 sm:$0xff]   ;;  %v682_v12 = vld [vmem:[#allocation5 + $0x20] ss:$8 sps:$4 sm:$0xff]   ;;  %v683_v13 = vld [vmem:[#allocation5 + $0x14] ss:$8 sps:$4 sm:$0xff]  }
  0x50   : > { %v685_v14 = vld [vmem:[#allocation5 + $0x10] ss:$8 sps:$4 sm:$0xff]   ;;  %v686_v15 = vld [vmem:[#allocation5 + $0x4] ss:$8 sps:$4 sm:$0xff]   ;;  %v688_v16 = vld [vmem:[#allocation5] ss:$8 sps:$4 sm:$0xff]  }
  0x51   : > { %362 = vmatpush1.bf16.msra.mxu0 %v670_v4  ;;  %v689_v17 = vld [vmem:[%s1000_s8] sm:$0xff]   ;;  %v264_v19 = vshrl.u32 %v263_v18, 7  ;;  %s234_s26 = scalar_lea.vmem [#allocation7], %s566_s24  ;;  %s594_s29 = sshll.u32 %s901_s19, 8 }
  0x52   : > { %363 = vmatprep.subr.bf16.mxu0 %v671_v5  ;;  %v261_v21 = vld [vmem:[%s1105_s2] sm:$0x3]  ;;  %s425_s28 = sshll.u32 %s234_s26, 4  ;;  %s1018_s12 = scalar_lea.vmem [#allocation8], %s566_s24  ;;  %s1016_s28 = int_to_ptr.vmem [resolvable:$true] %s425_s28 }
  0x53   : > { %v265_v20 = vsub.s32 0, %v264_v19  ;;  %v269_v22 = vsub.s32 1, %v264_v19  ;;  %s441_s11 = sshll.u32 %s1018_s12, 4  ;;  %s1024_s20 = scalar_lea.hbm %s1106_s3, %s594_s29  ;;  %s1027_s11 = int_to_ptr.vmem [resolvable:$true] %s441_s11 }
  0x54   : > { %s1032_s30 = scalar_lea.hbm %s1107_s4, %s594_s29  ;;  %s407_s6 = scalar_lea.sflag [#allocation4], %s996_s5 }
  0x55   : > { %364 = vmatpush1.bf16.msra.mxu0 %v673_v6  ;;  %v266_v23 = vrot.slane %v261_v21, %v265_v20  ;;  %v270_v24 = vrot.slane %v261_v21, %v269_v22  ;;  %s744_s7 = scalar_lea.vmem %s1016_s28, 256  ;;  %p1123_p11 = scmp.ne.s32.totalorder %s1117_s10, 0 }
  0x56   : > { %365 = vmatprep.subr.bf16.mxu0 %v674_v7  ;;  %p745_p3 = scmp.ne.s32.totalorder %s1016_s28, %s744_s7  ;;  %s851_s8 = smov [#allocation7]  }
  0x57   : > { %s748_s21 = sshll.u32 %s851_s8, 4  ;;  %s749_s21 = int_to_ptr.vmem [resolvable:$false] %s748_s21 }
  0x58   : > { %p746_p7 = pnand %p745_p3, %p1123_p11  ;;  %s750_s23 = scalar_lea.vmem %s749_s21, 512 }
  0x59   : > { %366 = vmatpush1.bf16.msra.mxu0 %v676_v8  ;;  %p751_p10 = scmp.lt.s32.totalorder %s1016_s28, %s749_s21  ;;  %p752_p2 = scmp.lt.s32.totalorder %s750_s23, %s744_s7 }
  0x5a   : > { %367 = vmatprep.subr.bf16.mxu0 %v677_v9  ;;  %p747_p12 = pneg %p746_p7 }
  0x5b   : > { %p753_p13 = por %p752_p2, %p751_p10 }
  0x5d   : > { %368 = vmatpush1.bf16.msra.mxu0 %v679_v10  ;;  %p754_p0 = pnand %p753_p13, %p747_p12 }
  0x5e   : > { %369 = vmatprep.subr.bf16.mxu0 %v680_v11 }
  0x61   : > { %370 = vmatpush1.bf16.msra.mxu0 %v682_v12 }
  0x62   : > { %371 = vmatprep.subr.bf16.mxu0 %v683_v13 }
  0x65   : > { %372 = vmatpush1.bf16.msra.mxu0 %v685_v14 }
  0x66   : > { %373 = vmatprep.subr.bf16.mxu0 %v686_v15 }
  0x69   : > { %374 = vmatpush1.bf16.msra.mxu0 %v688_v16 }
  0x6c   : > { %392 = vmatmul.mubr.bf16.vlgmr.msra.gmra.mxu0 %v689_v17 }
 0x12c   : > { %v393_v25 = vpop.f32.mrf.mxu0 }
 0x12d   : > { %v394_v26 = vadd.f32 %v393_v25, %v266_v23 }
 0x12e   : > { %v395_v27 = vpop.f32.mrf.mxu0 }
 0x12f   : > { %402 = vst [vmem:[%s234_s26] sm:$0xff] %v394_v26  ;;  %v396_v28 = vadd.f32 %v395_v27, %v270_v24 }
 0x130   : > { %v397_v29 = vpop.f32.mrf.mxu0 }
 0x131   : > { %404 = vst [vmem:[%s1018_s12] sm:$0xff] %v396_v28  ;;  %v398_v30 = vadd.f32 %v397_v29, %v266_v23 }
 0x132   : > { %v399_v31 = vpop.f32.mrf.mxu0 }
 0x133   : > { %403 = vst [vmem:[%s234_s26 + $0x8] sm:$0xff] %v398_v30  ;;  %v400_v32 = vadd.f32 %v399_v31, %v270_v24 }
 0x134   : > { %757 = shalt.err (!%p754_p0)
}
 0x135   : > { %s758_s24 = scalar_lea.hbm %s1024_s20, 256  ;;  %s762_s13 = scalar_lea.hbm %s1106_s3, 512 }
 0x136   : > { %p759_p5 = scmp.ne.s32.totalorder %s1024_s20, %s758_s24  ;;  %p763_p4 = scmp.lt.s32.totalorder %s1024_s20, %s1106_s3 }
 0x137   : > { %p764_p6 = scmp.lt.s32.totalorder %s762_s13, %s758_s24 }
 0x138   : > { %p760_p9 = pnand %p759_p5, %p1123_p11 }
 0x139   : > { %p765_p8 = por %p764_p6, %p763_p4 }
 0x13a   : > { %p761_p1 = pneg %p760_p9 }
 0x13c   : > { %p766_p3 = pnand %p765_p8, %p761_p1 }
 0x13e   : > { %769 = shalt.err (!%p766_p3)
}
 0x13f   : > { %s852_s25 = smov 128   ;;  %s853_s7 = smov 8   ;;  %405 = vst [vmem:[%s1018_s12 + $0x8] sm:$0xff] %v400_v32 }
 0x140   : > { %602 = dma.vmem_to_hbm [thread:$0]  (%p1123_p11), %s1016_s28, 256, %s1024_s20, %s407_s6, %s852_s25, %s852_s25, %s853_s7  }
 0x141   : > { %s412_s8 = scalar_lea.sflag [#allocation9], %s996_s5  ;;  %s770_s21 = scalar_lea.vmem %s1027_s11, 256 }
 0x142   : > { %p771_p7 = scmp.ne.s32.totalorder %s1027_s11, %s770_s21  ;;  %s854_s23 = smov [#allocation8]  }
 0x143   : > { %s774_s24 = sshll.u32 %s854_s23, 4  ;;  %s775_s24 = int_to_ptr.vmem [resolvable:$false] %s774_s24 }
 0x144   : > { %p772_p12 = pnand %p771_p7, %p1123_p11  ;;  %s776_s26 = scalar_lea.vmem %s775_s24, 512 }
 0x145   : > { %p777_p2 = scmp.lt.s32.totalorder %s1027_s11, %s775_s24  ;;  %p778_p13 = scmp.lt.s32.totalorder %s776_s26, %s770_s21 }
 0x146   : > { %p773_p10 = pneg %p772_p12 }
 0x147   : > { %p779_p0 = por %p778_p13, %p777_p2 }
 0x149   : > { %p780_p5 = pnand %p779_p0, %p773_p10 }
 0x14b   : > { %783 = shalt.err (!%p780_p5)
}
 0x14c   : > { %s784_s28 = scalar_lea.hbm %s1032_s30, 256  ;;  %s788_s20 = scalar_lea.hbm %s1107_s4, 512 }
 0x14d   : > { %p785_p9 = scmp.ne.s32.totalorder %s1032_s30, %s784_s28  ;;  %p789_p6 = scmp.lt.s32.totalorder %s1032_s30, %s1107_s4 }
 0x14e   : > { %p790_p8 = scmp.lt.s32.totalorder %s788_s20, %s784_s28 }
 0x14f   : > { %p786_p1 = pnand %p785_p9, %p1123_p11 }
 0x150   : > { %p791_p3 = por %p790_p8, %p789_p6 }
 0x151   : > { %p787_p4 = pneg %p786_p1 }
 0x153   : > { %p792_p7 = pnand %p791_p3, %p787_p4 }
 0x155   : > { %795 = shalt.err (!%p792_p7)
}
 0x156   : > { %603 = dma.vmem_to_hbm [thread:$0]  (%p1123_p11), %s1027_s11, 256, %s1032_s30, %s412_s8, %s852_s25, %s852_s25, %s853_s7  }
 0x157 PF: > { %s456_s13 = sand.u32 1, %s830_s15   ;;  %p1124_p12 = scmp.ne.s32.totalorder %s1113_s22, 0 }
 0x158   : > { %p1125_p10 = scmp.ge.s32.totalorder %s842_s18, 2  ;;  %s457_s14 = scalar_lea.sflag [#allocation4], %s456_s13 }
 0x15a   : > { %p615_p2 = pnand %p1125_p10, %p1124_p12 }
 0x15c   : > { %p616_p13 = pneg %p615_p2 }
 0x15e   : > { %821 = dma.done.wait (%p616_p13), %s457_s14, 256  }
 0x15f   : > { %823 = vsyncadd (%p616_p13), %s457_s14, 4294967040  ;;  %s466_s19 = scalar_lea.sflag [#allocation9], %s456_s13 }
 0x160   : > { %825 = dma.done.wait (%p616_p13), %s466_s19, 256  }
 0x161   : > { %827 = vsyncadd (%p616_p13), %s466_s19, 4294967040  ;;  %p22_p11 = scmp.ge.s32.totalorder %s934_s27, 4   ;;  %s1126_s15 = smov %s834_s16 }
 0x162   : > { %s1127_s16 = smov %s838_s17  ;;  %s1128_s17 = smov %s951_s9 }
 0x163   : > { %s1129_s18 = smov %s934_s27  ;;  %24 = sbr.rel (!%p22_p11) target bundleno = 8 (0x8), region = 98 }
 0x168   :  { %471 = vsyncpa [#allocation3], 1 }
 0x169   :  { %473 = vsyncpa [#allocation3 + $0x1], 1 }
 0x16a   :  { %474 = vsyncpa [#allocation6], 1 }
 0x16b   :  { %475 = vsyncpa [#allocation4], 1 }
 0x16c   :  { %477 = vsyncpa [#allocation4 + $0x1], 1 }
 0x16d   :  { %478 = vsyncpa [#allocation9], 1 }
 0x16e   :  { %480 = vsyncpa [#allocation9 + $0x1], 1 }

</bundles_post_ra>
